<compile_context>
chip_gen: v7x
topology: tpu7x:2x2x1
jax: 0.10.0
libtpu: 0.0.40
codegen_flags: <defaults>
</compile_context>

<pallas_src>
import math

import jax
import jax.numpy as jnp
from jax.experimental import pallas as pl
from jax.experimental.pallas import tpu as pltpu

_LANE = 128
_SUBLANE = 8


def _frozen_bn_kernel(scale_ref, shift_ref, x_ref, o_ref):
    # scale/shift refs: (TR, 1) f32 ; x/o refs: (TR, TS)
    y = x_ref[...].astype(jnp.float32) * scale_ref[...] + shift_ref[...]
    o_ref[...] = y.astype(o_ref.dtype)


def _vmem_capacity_bytes():
    try:
        cap = getattr(pltpu.get_tpu_info(), "vmem_capacity_bytes", None)
        if cap:
            return int(cap)
    except Exception:
        pass
    return 64 * 1024 * 1024  # conservative default (v7x per-core VMEM)


def _divisor_tiles(total, unit, cap):
    """Divisors of `total` that are multiples of `unit`, descending, each <= cap."""
    out = []
    for k in range(min(total, cap) // unit, 0, -1):
        t = k * unit
        if total % t == 0:
            out.append(t)
    return out


def _row_tile_candidates(R, itemsize):
    # Prefer the native sublane packing for the dtype (8 f32 / 16 bf16 / 32 i8).
    sub = _SUBLANE * max(1, 4 // max(itemsize, 1))
    if R % sub == 0:
        return _divisor_tiles(R, sub, 4096)
    if R % _SUBLANE == 0:
        return _divisor_tiles(R, _SUBLANE, 4096)
    return [R]  # full-extent row block (always legal)


def _pick_tiles(R, S, itemsize, ws_budget):
    row_cands = _row_tile_candidates(R, itemsize)
    if S % _LANE == 0:
        # Lane tiles: 128..2048 (measured sweet spot), divisors of S.
        lane_cands = _divisor_tiles(S, _LANE, 2048)
    else:
        lane_cands = [S]  # full-extent lane block (legal, avoids padding)

    def working_set(tr, ts):
        # double-buffered input block + double-buffered output block
        return 4 * tr * ts * itemsize

    tr_min = row_cands[-1]
    ts = next((t for t in lane_cands if working_set(tr_min, t) <= ws_budget),
              lane_cands[-1])
    tr = next((t for t in row_cands if working_set(t, ts) <= ws_budget), tr_min)
    return tr, ts


def _ensure_multi_step(R, S, tr, ts):
    """Split a single-step grid so both v7x TensorCores get work (cheap elsewhere)."""
    if (R // tr) * (S // ts) >= 2:
        return tr, ts
    if tr >= 2 * _SUBLANE and (tr // 2) % _SUBLANE == 0 and R % (tr // 2) == 0:
        return tr // 2, ts
    if ts >= 2 * _LANE and (ts // 2) % _LANE == 0 and S % (ts // 2) == 0:
        return tr, ts // 2
    return tr, ts


def frozen_batch_norm_nd(x, weight, bias, running_mean, running_var, eps=1e-5):
    """x: (N, C, *spatial); weight/bias/running_mean/running_var: (C,)."""
    N, C = x.shape[0], x.shape[1]
    spatial = x.shape[2:]
    S = math.prod(spatial) if spatial else 1
    R = N * C

    # ---- Precompute per-channel scale/shift in the wrapper (tiny ops) ----
    w = weight.astype(jnp.float32)
    b = bias.astype(jnp.float32)
    rm = running_mean.astype(jnp.float32)
    rv = running_var.astype(jnp.float32)
    scale_c = w * jax.lax.rsqrt(rv + eps)              # (C,)
    shift_c = b - rm * scale_c                         # (C,)
    scale_r = jnp.tile(scale_c, (N,)).reshape(R, 1)    # per (n, c) row
    shift_r = jnp.tile(shift_c, (N,)).reshape(R, 1)

    # ---- Lane-dense 2-D layout (pure reshape, no data movement) ----
    x2 = x.reshape(R, S)

    itemsize = jnp.dtype(x.dtype).itemsize
    cap = _vmem_capacity_bytes()
    ws_budget = min(int(cap * 0.4), 96 * 1024 * 1024)     # ~25 MiB v7x, ~51 MiB v5e/v6e
    vmem_limit = min(int(cap * 0.5), 100 * 1024 * 1024)

    # If the lane dim is not a multiple of 128, prefer a full-extent lane block
    # (no pad / slice HBM passes).  Pad only if that block would blow the budget.
    S_eff = S
    padded = False
    if S % _LANE != 0:
        tr_min = _row_tile_candidates(R, itemsize)[-1]
        if 4 * tr_min * S * itemsize > ws_budget:
            S_eff = pl.cdiv(S, _LANE) * _LANE
            x2 = jnp.pad(x2, ((0, 0), (0, S_eff - S)))
            padded = True

    # ---- Budget-aware, generation-aware tiling ----
    TR, TS = _pick_tiles(R, S_eff, itemsize, ws_budget)
    TR, TS = _ensure_multi_step(R, S_eff, TR, TS)
    grid = (R // TR, S_eff // TS)   # lane axis last => param blocks reused across it

    param_spec = pl.BlockSpec((TR, 1), lambda i, j: (i, 0))
    x_spec = pl.BlockSpec((TR, TS), lambda i, j: (i, j))
    o_spec = pl.BlockSpec((TR, TS), lambda i, j: (i, j))

    out = pl.pallas_call(
        _frozen_bn_kernel,
        out_shape=jax.ShapeDtypeStruct((R, S_eff), x.dtype),
        grid=grid,
        in_specs=[param_spec, param_spec, x_spec],
        out_specs=o_spec,
        compiler_params=pltpu.CompilerParams(
            dimension_semantics=("parallel", "parallel"),
            vmem_limit_bytes=vmem_limit,
        ),
    )(scale_r, shift_r, x2)

    if padded:
        out = out[:, :S]
    return out.reshape(x.shape)


def frozen_batch_norm_nd_ref(x, weight, bias, running_mean, running_var, eps=1e-5):
    dims = x.ndim - 2
    shape = (1, -1) + (1,) * dims
    w = weight.reshape(shape).astype(jnp.float32)
    b = bias.reshape(shape).astype(jnp.float32)
    rv = running_var.reshape(shape).astype(jnp.float32)
    rm = running_mean.reshape(shape).astype(jnp.float32)
    scale = w * jax.lax.rsqrt(rv + eps)
    shift = b - rm * scale
    return (x.astype(jnp.float32) * scale + shift).astype(x.dtype)


if __name__ == "__main__":
    eps = 1e-5
    key = jax.random.PRNGKey(0)
    kx, kw, kb, km, kv, kx2 = jax.random.split(key, 6)

    # Shared (C,) buffers (random so the test is non-trivial; running_var > 0).
    C = 4
    weight = jax.random.normal(kw, (C,), dtype=jnp.float32)
    bias = jax.random.normal(kb, (C,), dtype=jnp.float32)
    running_mean = jax.random.normal(km, (C,), dtype=jnp.float32)
    running_var = jnp.abs(jax.random.normal(kv, (C,), dtype=jnp.float32)) + 0.5

    # --- Case 1: module default dims=3, f32, lane-friendly spatial (S = 2048) ---
    N, D, H, W = 2, 4, 16, 16
    x = jax.random.normal(kx, (N, C, D, H, W), dtype=jnp.float32)
    y = jax.block_until_ready(
        frozen_batch_norm_nd(x, weight, bias, running_mean, running_var, eps))
    y_ref = frozen_batch_norm_nd_ref(x, weight, bias, running_mean, running_var, eps)
    assert y.shape == x.shape and y.dtype == x.dtype
    assert jnp.allclose(y, y_ref, atol=1e-5, rtol=1e-5)

    # --- Case 2: bf16 input, spatial NOT a multiple of 128 (full-extent lane path) ---
    xb = jax.random.normal(kx2, (2, C, 3, 7, 7), dtype=jnp.float32).astype(jnp.bfloat16)
    yb = jax.block_until_ready(
        frozen_batch_norm_nd(xb, weight, bias, running_mean, running_var, eps))
    yb_ref = frozen_batch_norm_nd_ref(xb, weight, bias, running_mean, running_var, eps)
    assert yb.shape == xb.shape and yb.dtype == xb.dtype
    assert jnp.allclose(yb.astype(jnp.float32), yb_ref.astype(jnp.float32),
                        atol=2e-2, rtol=2e-2)

    print("KERNEL_OK")
</pallas_src>

<mosaic_0001>
module attributes {stable_mosaic.version = 11 : i64} {
  func.func @_frozen_bn_kernel(%arg0: i32, %arg1: i32, %arg2: memref<8x1xf32, #tpu.memory_space<vmem>>, %arg3: memref<8x1xf32, #tpu.memory_space<vmem>>, %arg4: memref<8x512xf32, #tpu.memory_space<vmem>>, %arg5: memref<8x512xf32, #tpu.memory_space<vmem>>) attributes {dimension_semantics = [#tpu.dimension_semantics<parallel>, #tpu.dimension_semantics<parallel>], iteration_bounds = array<i64: 1, 2>, scalar_prefetch = 0 : i64, scratch_operands = 0 : i64, tpu.core_type = #tpu.core_type<tc>, window_params = [{transform_indices = @transform_0, window_bounds = array<i64: 8, 1>}, {transform_indices = @transform_1, window_bounds = array<i64: 8, 1>}, {transform_indices = @transform_2, window_bounds = array<i64: 8, 512>}, {transform_indices = @transform_3, window_bounds = array<i64: 8, 512>}]} {
    %c0 = arith.constant 0 : index
    %c0_0 = arith.constant 0 : index
    %0 = vector.load %arg4[%c0, %c0_0] : memref<8x512xf32, #tpu.memory_space<vmem>>, vector<8x512xf32>
    %c0_1 = arith.constant 0 : index
    %c0_2 = arith.constant 0 : index
    %1 = vector.load %arg2[%c0_1, %c0_2] : memref<8x1xf32, #tpu.memory_space<vmem>>, vector<8x1xf32>
    %2 = vector.broadcast %1 : vector<8x1xf32> to vector<8x512xf32>
    %3 = arith.mulf %0, %2 : vector<8x512xf32>
    %c0_3 = arith.constant 0 : index
    %c0_4 = arith.constant 0 : index
    %4 = vector.load %arg3[%c0_3, %c0_4] : memref<8x1xf32, #tpu.memory_space<vmem>>, vector<8x1xf32>
    %5 = vector.broadcast %4 : vector<8x1xf32> to vector<8x512xf32>
    %6 = arith.addf %3, %5 : vector<8x512xf32>
    %c0_5 = arith.constant 0 : index
    %c0_6 = arith.constant 0 : index
    %7 = vector.load %arg5[%c0_5, %c0_6] : memref<8x512xf32, #tpu.memory_space<vmem>>, vector<8x512xf32>
    tpu.vector_store %arg5[%c0_5, %c0_6], %6 {strides = array<i32>} : memref<8x512xf32, #tpu.memory_space<vmem>>, vector<8x512xf32>,
    return
  }
  func.func @transform_0(%arg0: i32, %arg1: i32) -> (i32, i32) {
    %c0_i32 = arith.constant 0 : i32
    %c0_i32_0 = arith.constant 0 : i32
    return %arg0, %c0_i32 : i32, i32
  }
  func.func @transform_1(%arg0: i32, %arg1: i32) -> (i32, i32) {
    %c0_i32 = arith.constant 0 : i32
    %c0_i32_0 = arith.constant 0 : i32
    return %arg0, %c0_i32 : i32, i32
  }
  func.func @transform_2(%arg0: i32, %arg1: i32) -> (i32, i32) {
    %c0_i32 = arith.constant 0 : i32
    return %arg0, %arg1 : i32, i32
  }
  func.func @transform_3(%arg0: i32, %arg1: i32) -> (i32, i32) {
    %c0_i32 = arith.constant 0 : i32
    return %arg0, %arg1 : i32, i32
  }
}

</mosaic_0001>

<bundles_post_ra>
// kernel: tpu_custom_call.1
= control target key start
LH: loop header
LB: loop body
LE: loop exit
PB: predicated region body
PF: predicated region fallthrough
CT: control target
= control target key end

     0   :  { %8 = vsyncpa [#allocation3], 0  ;;  %s798_s0 = inlined_call_operand.vmem [shape: f32[8,1], index: 0, kind: input, shape index: {}]   ;;  %s799_s1 = inlined_call_operand.vmem [shape: f32[8,1], index: 1, kind: input, shape index: {}]   ;;  %s800_s2 = inlined_call_operand.hbm [shape: f32[8,1024], index: 2, kind: input, shape index: {}]   ;;  %s801_s3 = inlined_call_operand.hbm [shape: f32[8,1024], index: 3, kind: output, shape index: {}]  }
   0x1   :  { %10 = vsyncpa [#allocation3 + $0x1], 0 }
   0x2   :  { %11 = vsyncpa [#allocation4], 0 }
   0x3   :  { %13 = vsyncpa [#allocation4 + $0x1], 0  ;;  %s620_s12 = smov 0   ;;  %s622_s13 = smov 0  }
   0x4   :  { %s624_s14 = smov 0   ;;  %s626_s15 = smov 0  }
   0x5   :  { %s628_s16 = smov 0   ;;  %s630_s17 = smov 0  }
   0x6 LB: > { %s400_s18 = sadd.s32 4294967295, %s595_s17   ;;  %s401_s19 = sadd.s32 4294967294, %s595_s17   ;;  %s595_s17 = sphi %s630_s17, %s19_s17   ;;  %s591_s16 = sphi %s628_s16, %s817_s16   ;;  %s587_s15 = sphi %s626_s15, %s816_s15   ;;  %s583_s14 = sphi %s624_s14, %s815_s14   ;;  %s579_s13 = sphi %s622_s13, %s814_s13   ;;  %s575_s12 = sphi %s620_s12, %s813_s12  }
   0x7   : > { %s28_s20 = sadd.s32 1, %s591_s16  ;;  %s92_s21 = sadd.s32 1, %s583_s14 }
   0x8   : > { %p29_p0 = scmp.ge.s32.totalorder %s28_s20, 2  ;;  %p99_p1 = scmp.ne.s32.totalorder %s583_s14, %s579_s13 }
   0x9   : > { %p100_p2 = scmp.eq.s32.totalorder %s595_s17, 0  ;;  %p105_p3 = scmp.ne.s32.totalorder %s579_s13, %s575_s12 }
   0xa   : > { %s819_s20 = smov (%p29_p0, %s28_s20), 0  ;;  %p106_p5 = scmp.eq.s32.totalorder %s400_s18, 0 }
   0xb   : > { %p661_p4 = por %p100_p2, %p99_p1  ;;  %s88_s23 = ssub.s32 %s591_s16, %s819_s20 }
   0xc   : > { %p131_p6 = scmp.eq.s32.totalorder %s400_s18, 1  ;;  %p90_p7 = scmp.eq.s32.totalorder %s88_s23, 0 }
   0xd   : > { %p667_p8 = por %p106_p5, %p105_p3  ;;  %p137_p10 = scmp.eq.s32.totalorder %s401_s19, 1 }
   0xe   : > { %p671_p9 = por %p131_p6, %p99_p1  ;;  %p431_p13 = scmp.lt.s32.totalorder %s595_s17, 2 }
   0xf   : > { %s676_s26 = scalar_select %p90_p7, %s583_s14, %s92_s21  }
  0x10   : > { %s805_s25 = scalar_select %p671_p9, 1, 0 }
  0x11   : > { %p678_p11 = por %p137_p10, %p105_p3  ;;  %s171_s28 = sand.u32 1, %s583_s14  }
  0x12   : > { %s406_s29 = sshll.u32 %s171_s28, 5  ;;  %s417_s30 = sshll.u32 %s591_s16, 9 }
  0x13   : > { %s806_s27 = scalar_select %p678_p11, 1, 0 }
  0x14   : > { %s689_s6 = scalar_lea.hbm %s800_s2, %s417_s30  ;;  %s175_s7 = scalar_lea.vmem [#allocation2], %s406_s29 }
  0x15   : > { %s185_s8 = sshll.u32 %s175_s7, 4  ;;  %p695_p0 = pnand %p431_p13, %p661_p4  ;;  %s691_s8 = int_to_ptr.vmem [resolvable:$true] %s185_s8 }
  0x16   : > { %s172_s10 = scalar_lea.sflag [#allocation3], %s171_s28  ;;  %s483_s11 = scalar_lea.hbm %s689_s6, 512 }
  0x17   : > { %p484_p3 = scmp.ne.s32.totalorder %s689_s6, %s483_s11  ;;  %p485_p5 = pneg %p695_p0 }
  0x18   : > { %s488_s21 = scalar_lea.hbm %s800_s2, 1024  ;;  %p489_p4 = scmp.lt.u32.totalorder %s689_s6, %s800_s2 }
  0x19   : > { %p486_p6 = pnand %p485_p5, %p484_p3  ;;  %p490_p10 = scmp.lt.u32.totalorder %s488_s21, %s483_s11 }
  0x1a   : > { %p492_p12 = scmp.lt.u32.totalorder %s483_s11, %s689_s6 }
  0x1b   : > { %p487_p7 = pneg %p486_p6  ;;  %p491_p13 = por %p490_p10, %p489_p4 }
  0x1d   : > { %p493_p1 = por %p492_p12, %p491_p13 }
  0x1f   : > { %p494_p2 = pnand %p493_p1, %p487_p7 }
  0x21   : > { %497 = shalt.err (!%p494_p2)
}
  0x22   : > { %s498_s28 = scalar_lea.vmem %s691_s8, 512  ;;  %s597_s29 = smov [#allocation2]  }
  0x23   : > { %p499_p3 = scmp.ne.s32.totalorder %s691_s8, %s498_s28  ;;  %s503_s30 = sshll.u32 %s597_s29, 4  ;;  %s504_s30 = int_to_ptr.vmem [resolvable:$false] %s503_s30 }
  0x24   : > { %s505_s4 = scalar_lea.vmem %s504_s30, 1024  ;;  %p506_p9 = scmp.lt.s32.totalorder %s691_s8, %s504_s30 }
  0x25   : > { %p501_p6 = pnand %p499_p3, %p485_p5  ;;  %p507_p4 = scmp.lt.s32.totalorder %s505_s4, %s498_s28 }
  0x27   : > { %p502_p11 = pneg %p501_p6  ;;  %p508_p10 = por %p507_p4, %p506_p9 }
  0x29   : > { %p509_p12 = pnand %p508_p10, %p502_p11 }
  0x2b   : > { %512 = shalt.err (!%p509_p12)
}
  0x2c   : > { %426 = dma.hbm_to_vmem [thread:$0]  (!%p695_p0), %s689_s6, 512, %s691_s8, %s172_s10  }
  0x2d   : > { %p808_p1 = scmp.lt.s32.totalorder %s595_s17, 3  ;;  %p809_p2 = scmp.ge.s32.totalorder %s595_s17, 1 }
  0x2f   : > { %p191_p5 = pnand %p809_p2, %p808_p1 }
  0x30   : > { %s731_s5 = sand.u32 (!%p191_p5), 1, %s579_s13  }
  0x31   : > { %194 = sbr.rel (%p191_p5) target bundleno = 208 (0xd0), region = 32  ;;  %s410_s7 = sshll.u32 (!%p191_p5), %s731_s5, 5 }
  0x32   : > { %s197_s11 = scalar_lea.sflag (!%p191_p5), [#allocation3], %s731_s5  ;;  %s200_s18 = scalar_lea.vmem (!%p191_p5), [#allocation2], %s410_s7 }
  0x38   : > { %566 = dma.done.wait (%p667_p8), %s197_s11, 512  }
  0x39   : > { %568 = vsyncadd (%p667_p8), %s197_s11, 4294966784  ;;  %v598_v0 = vmov 0   ;;  %v245_v1 = vld [vmem:[%s798_s0] sm:$0xff]  ;;  %v242_v5 = vld [vmem:[%s200_s18 + $0x8] sm:$0xff]  ;;  %s418_s24 = sshll.u32 %s587_s15, 9  ;;  %s230_s19 = scalar_lea.vmem [#allocation5], %s410_s7 }
  0x3a   : > { %482 = vset.pattern.permute.xlu0 %v598_v0  ;;  %v255_v2 = vld [vmem:[%s799_s1] sm:$0xff]  ;;  %v243_v6 = vld [vmem:[%s200_s18 + $0x10] sm:$0xff]  ;;  %v244_v7 = vld [vmem:[%s200_s18 + $0x18] sm:$0xff]  ;;  %s286_s21 = sshll.u32 %s230_s19, 4  ;;  %s749_s28 = scalar_lea.hbm %s801_s3, %s418_s24  ;;  %s751_s21 = int_to_ptr.vmem [resolvable:$true] %s286_s21 }
  0x3b   : > { %248 = vperm.xlu0 %482, %v245_v1   ;;  %v241_v3 = vld [vmem:[%s200_s18] sm:$0xff]  ;;  %s270_s15 = scalar_lea.sflag [#allocation4], %s731_s5  ;;  %s513_s29 = scalar_lea.vmem %s751_s21, 512 }
  0x3c   : > { %p514_p8 = scmp.ne.s32.totalorder %s751_s21, %s513_s29  ;;  %p810_p9 = scmp.ne.s32.totalorder %s805_s25, 0 }
  0x3d   : > { %s599_s30 = smov [#allocation5]  }
  0x3e   : > { %p515_p11 = pnand %p514_p8, %p810_p9  ;;  %s517_s4 = sshll.u32 %s599_s30, 4  ;;  %s518_s4 = int_to_ptr.vmem [resolvable:$false] %s517_s4 }
  0x3f   : > { %258 = vperm.xlu0 %482, %v255_v2   ;;  %s519_s7 = scalar_lea.vmem %s518_s4, 1024  ;;  %p520_p7 = scmp.lt.s32.totalorder %s751_s21, %s518_s4 }
  0x40   : > { %p516_p0 = pneg %p515_p11  ;;  %p521_p13 = scmp.lt.s32.totalorder %s519_s7, %s513_s29 }
  0x42   : > { %p522_p3 = por %p521_p13, %p520_p7 }
  0x44   : > { %p523_p6 = pnand %p522_p3, %p516_p0 }
  0xba   : > { %v249_v4 = vpop.permute.xlu0 %248 }
  0xbb   : > { %v251_v8 = vmul.f32 %v249_v4, %v241_v3  ;;  %v252_v9 = vmul.f32 %v249_v4, %v242_v5  ;;  %v253_v10 = vmul.f32 %v249_v4, %v243_v6  ;;  %v254_v11 = vmul.f32 %v249_v4, %v244_v7 }
  0xbe   : > { %v259_v12 = vpop.permute.xlu0 %258 }
  0xbf   : > { %v261_v13 = vadd.f32 %v259_v12, %v251_v8  ;;  %v262_v14 = vadd.f32 %v259_v12, %v252_v9  ;;  %v263_v15 = vadd.f32 %v259_v12, %v253_v10  ;;  %v264_v16 = vadd.f32 %v259_v12, %v254_v11 }
  0xc1   : > { %265 = vst [vmem:[%s230_s19] sm:$0xff] %v261_v13  ;;  %266 = vst [vmem:[%s230_s19 + $0x8] sm:$0xff] %v262_v14 }
  0xc2   : > { %267 = vst [vmem:[%s230_s19 + $0x10] sm:$0xff] %v263_v15  ;;  %268 = vst [vmem:[%s230_s19 + $0x18] sm:$0xff] %v264_v16 }
  0xc3   : > { %526 = shalt.err (!%p523_p6)
}
  0xc4   : > { %s527_s5 = scalar_lea.hbm %s749_s28, 512  ;;  %s531_s6 = scalar_lea.hbm %s801_s3, 1024 }
  0xc5   : > { %p528_p4 = scmp.ne.s32.totalorder %s749_s28, %s527_s5  ;;  %p532_p1 = scmp.lt.u32.totalorder %s749_s28, %s801_s3 }
  0xc6   : > { %p533_p2 = scmp.lt.u32.totalorder %s531_s6, %s527_s5  ;;  %p535_p8 = scmp.lt.u32.totalorder %s527_s5, %s749_s28 }
  0xc7   : > { %p529_p10 = pnand %p528_p4, %p810_p9 }
  0xc8   : > { %p534_p5 = por %p533_p2, %p532_p1 }
  0xc9   : > { %p530_p12 = pneg %p529_p10 }
  0xca   : > { %p536_p11 = por %p535_p8, %p534_p5 }
  0xcc   : > { %p537_p0 = pnand %p536_p11, %p530_p12 }
  0xce   : > { %540 = shalt.err (!%p537_p0)
}
  0xcf   : > { %421 = dma.vmem_to_hbm [thread:$0]  (%p810_p9), %s751_s21, 512, %s749_s28, %s270_s15  }
  0xd0 PF: > { %s298_s10 = sand.u32 1, %s575_s12   ;;  %p811_p7 = scmp.ne.s32.totalorder %s806_s27, 0 }
  0xd1   : > { %p812_p13 = scmp.ge.s32.totalorder %s595_s17, 2  ;;  %s299_s24 = scalar_lea.sflag [#allocation4], %s298_s10 }
  0xd3   : > { %p428_p3 = pnand %p812_p13, %p811_p7 }
  0xd5   : > { %570 = dma.done.wait (!%p428_p3), %s299_s24, 512  }
  0xd6   : > { %572 = vsyncadd (!%p428_p3), %s299_s24, 4294966784  ;;  %s19_s17 = sadd.s32 1, %s595_s17   ;;  %s813_s12 = smov %s579_s13 }
  0xd7   : > { %p16_p6 = scmp.ge.s32.totalorder %s19_s17, 4   ;;  %s814_s13 = smov %s583_s14 }
  0xd8   : > { %s815_s14 = smov %s676_s26  ;;  %s816_s15 = smov %s591_s16 }
  0xd9   : > { %s817_s16 = smov %s819_s20  ;;  %18 = sbr.rel (!%p16_p6) target bundleno = 6 (0x6), region = 83 }
  0xe0   :  { %304 = vsyncpa [#allocation3], 1 }
  0xe1   :  { %306 = vsyncpa [#allocation3 + $0x1], 1 }
  0xe2   :  { %307 = vsyncpa [#allocation4], 1 }
  0xe3   :  { %309 = vsyncpa [#allocation4 + $0x1], 1 }

</bundles_post_ra>
